<compile_context>
chip_gen: v7x
topology: tpu7x:2x2x1
jax: 0.10.0
libtpu: 0.0.40
codegen_flags: <defaults>
</compile_context>

<pallas_src>
import functools

import jax
import jax.numpy as jnp
from jax.experimental import pallas as pl
from jax.experimental.pallas import tpu as pltpu


def _round_up(a, m):
    return (a + m - 1) // m * m


def _banded_conv_weight(w, l_in, dtype=jnp.float32):
    """w: (KS, Cin, Cout) -> (l_in*Cin, l_out*Cout) banded matrix so that
    x_flat[(pos, chan)] @ BW == valid-conv1d output flat over (pos, chan)."""
    ks, cin, cout = w.shape
    l_out = l_in - ks + 1
    bw = jnp.zeros((l_in, cin, l_out, cout), jnp.float32)
    for k in range(ks):                      # ks * l_out <= ~42 static sets
        for l in range(l_out):
            bw = bw.at[l + k, :, l, :].set(w[k])
    return bw.reshape(l_in * cin, l_out * cout).astype(dtype)


def _conv_model_kernel(x_ref, bw1_ref, b1f_ref, bw2_ref, b2f_ref, wl_ref,
                       bl_ref, o_ref, *, L2, NF2):
    # x_ref: (TB, W*D) lane-dense block. One big matmul per conv layer.
    h1 = jnp.dot(x_ref[...], bw1_ref[...],
                 preferred_element_type=jnp.float32)          # (TB, L1*NF1)
    h1 = jnp.maximum(h1 + b1f_ref[...], 0.0)                  # bias + ReLU

    h2 = jnp.dot(h1, bw2_ref[...],
                 preferred_element_type=jnp.float32)          # (TB, L2*NF2)
    h2 = jnp.maximum(h2 + b2f_ref[...], 0.0)

    # AdaptiveMaxPool1d(1): max over the L2 valid positions.  Static lane
    # slices + VPU max; no reshape/relayout, no scratch round-trip.
    feat = h2[:, 0:NF2]
    for l in range(1, L2):                                    # static unroll
        feat = jnp.maximum(feat, h2[:, l * NF2:(l + 1) * NF2])

    out = jnp.dot(feat, wl_ref[...], preferred_element_type=jnp.float32)
    o_ref[...] = out + bl_ref[...]                            # (TB, D)


def conv_model_forward(x, params, *, block_rows=512, input_dtype=jnp.float32):
    """x: (B, W, D) float32.  params: (w1, b1, w2, b2, wl, bl)."""
    B, W, D = x.shape
    w1, b1, w2, b2, wl, bl = params
    KS, Cin1, NF1 = w1.shape
    NF2 = w2.shape[2]
    assert Cin1 == D and w2.shape[1] == NF1 and wl.shape == (NF2, D)
    L1 = W - (KS - 1)
    L2 = L1 - (KS - 1)
    assert L2 >= 1, "sequence length too short for two valid ks=%d convs" % KS

    # ---- wrapper-side weight prep (done once; tiny, VMEM-resident) ---------
    bw1 = _banded_conv_weight(w1, W, dtype=input_dtype)        # (W*D, L1*NF1)
    bw2 = _banded_conv_weight(w2, L1, dtype=jnp.float32)       # (L1*NF1, L2*NF2)
    b1f = jnp.tile(b1.reshape(1, NF1), (1, L1))                # (1, L1*NF1)
    b2f = jnp.tile(b2.reshape(1, NF2), (1, L2))                # (1, L2*NF2)

    # ---- batch tiling -------------------------------------------------------
    # min sublane tile: 8 for f32, 16 for bf16 (sublane packing).
    min_tile = 16 if input_dtype == jnp.bfloat16 else 8
    # Keep >= 2 grid steps when the batch allows it so both v7x TensorCores
    # get work; cap the block so the (lane-padded) double-buffered footprint
    # stays tiny on every generation (tb=512 f32 -> ~1 MiB for x).
    if B > min_tile:
        two_step = _round_up(pl.cdiv(B, 2), min_tile)
    else:
        two_step = _round_up(B, min_tile)
    tb = _round_up(max(min_tile, min(block_rows, two_step)), min_tile)
    b_pad = _round_up(B, tb)

    # Lane-dense x slab: (B, W*D); contiguous reshape, so it is free.
    x_flat = x.reshape(B, W * D).astype(input_dtype)
    if b_pad != B:
        # Zero-padded rows compute garbage that is sliced off at out[:B].
        x_flat = jnp.pad(x_flat, ((0, b_pad - B), (0, 0)))

    kernel = functools.partial(_conv_model_kernel, L2=L2, NF2=NF2)

    out = pl.pallas_call(
        kernel,
        out_shape=jax.ShapeDtypeStruct((b_pad, D), jnp.float32),
        grid_spec=pltpu.PrefetchScalarGridSpec(
            num_scalar_prefetch=0,
            grid=(b_pad // tb,),
            in_specs=[
                pl.BlockSpec((tb, W * D), lambda b: (b, 0)),           # x slab
                pl.BlockSpec((W * D, L1 * NF1), lambda b: (0, 0)),     # banded conv1
                pl.BlockSpec((1, L1 * NF1), lambda b: (0, 0)),         # conv1 bias
                pl.BlockSpec((L1 * NF1, L2 * NF2), lambda b: (0, 0)),  # banded conv2
                pl.BlockSpec((1, L2 * NF2), lambda b: (0, 0)),         # conv2 bias
                pl.BlockSpec((NF2, D), lambda b: (0, 0)),              # linear w
                pl.BlockSpec((1, D), lambda b: (0, 0)),                # linear b
            ],
            out_specs=pl.BlockSpec((tb, D), lambda b: (b, 0)),
        ),
        compiler_params=pltpu.CompilerParams(
            dimension_semantics=("parallel",)),
    )(x_flat, bw1, b1f, bw2, b2f, wl, bl)
    return out[:B]


def init_params(key, d, nf=4, ks=3):
    """Deterministic synthetic parameters matching ConvModel(d, w, nf=4, ks=3, n_conv=2)."""
    nf1, nf2 = nf, nf * 2
    k1, k2, k3, k4, k5, k6 = jax.random.split(key, 6)
    # conv weights stored as (ks, c_in, c_out); each tap is a (c_in, c_out) matmul
    w1 = jax.random.normal(k1, (ks, d, nf1), jnp.float32) * 0.1
    b1 = jax.random.normal(k2, (1, nf1), jnp.float32) * 0.01
    w2 = jax.random.normal(k3, (ks, nf1, nf2), jnp.float32) * 0.1
    b2 = jax.random.normal(k4, (1, nf2), jnp.float32) * 0.01
    # linear stored as (nf2, d) so out = feat @ wl + bl
    wl = jax.random.normal(k5, (nf2, d), jnp.float32) * 0.1
    bl = jax.random.normal(k6, (1, d), jnp.float32) * 0.01
    return w1, b1, w2, b2, wl, bl


def reference_forward(x, params):
    """Pure-JAX reference of the PyTorch forward (tap-sum conv math)."""
    w1, b1, w2, b2, wl, bl = params
    KS = w1.shape[0]
    B, W, D = x.shape
    L1 = W - KS + 1
    h1 = sum(jnp.einsum('bld,dc->blc', x[:, k:k + L1, :], w1[k]) for k in range(KS))
    h1 = jnp.maximum(h1 + b1[None, :, :], 0.0)
    L2 = L1 - KS + 1
    h2 = sum(jnp.einsum('blc,ce->ble', h1[:, k:k + L2, :], w2[k]) for k in range(KS))
    h2 = jnp.maximum(h2 + b2[None, :, :], 0.0)
    feat = jnp.max(h2, axis=1)              # (B, NF2) == AdaptiveMaxPool1d(1).squeeze
    return feat @ wl + bl                   # (B, D)


if __name__ == "__main__":
    B, W, D = 2, 16, 16                     # batch=2, seq len w=16, feature dim d=16
    key = jax.random.PRNGKey(0)
    kx, kp = jax.random.split(key)
    x = jax.random.normal(kx, (B, W, D), jnp.float32)
    params = init_params(kp, D, nf=4, ks=3)

    ref = reference_forward(x, params)

    # f32 path: bit-for-bit-ish vs the pure-JAX reference.
    out = jax.block_until_ready(conv_model_forward(x, params))
    assert out.shape == (B, D)
    assert jnp.allclose(out, ref, rtol=1e-5, atol=1e-5), "f32 mismatch vs reference"

    # bf16 input path (halves HBM bytes for x; f32 MXU accumulation).
    out_bf16 = jax.block_until_ready(
        conv_model_forward(x, params, input_dtype=jnp.bfloat16))
    assert jnp.allclose(out_bf16, ref, rtol=5e-2, atol=5e-2), "bf16 mismatch vs reference"

    print("KERNEL_OK")
</pallas_src>

<mosaic_0001>
module attributes {stable_mosaic.version = 11 : i64} {
  func.func @_conv_model_kernel(%arg0: i32, %arg1: memref<8x256xf32, #tpu.memory_space<vmem>>, %arg2: memref<256x56xf32, #tpu.memory_space<vmem>>, %arg3: memref<1x56xf32, #tpu.memory_space<vmem>>, %arg4: memref<56x96xf32, #tpu.memory_space<vmem>>, %arg5: memref<1x96xf32, #tpu.memory_space<vmem>>, %arg6: memref<8x16xf32, #tpu.memory_space<vmem>>, %arg7: memref<1x16xf32, #tpu.memory_space<vmem>>, %arg8: memref<8x16xf32, #tpu.memory_space<vmem>>) attributes {dimension_semantics = [#tpu.dimension_semantics<parallel>], iteration_bounds = array<i64: 1>, scalar_prefetch = 0 : i64, scratch_operands = 0 : i64, tpu.core_type = #tpu.core_type<tc>, window_params = [{transform_indices = @transform_0, window_bounds = array<i64: 8, 256>}, {pipeline_mode = #tpu.pipeline_mode<synchronous>, transform_indices = @transform_1, window_bounds = array<i64: 256, 56>}, {pipeline_mode = #tpu.pipeline_mode<synchronous>, transform_indices = @transform_2, window_bounds = array<i64: 1, 56>}, {pipeline_mode = #tpu.pipeline_mode<synchronous>, transform_indices = @transform_3, window_bounds = array<i64: 56, 96>}, {pipeline_mode = #tpu.pipeline_mode<synchronous>, transform_indices = @transform_4, window_bounds = array<i64: 1, 96>}, {pipeline_mode = #tpu.pipeline_mode<synchronous>, transform_indices = @transform_5, window_bounds = array<i64: 8, 16>}, {pipeline_mode = #tpu.pipeline_mode<synchronous>, transform_indices = @transform_6, window_bounds = array<i64: 1, 16>}, {transform_indices = @transform_7, window_bounds = array<i64: 8, 16>}]} {
    %c0 = arith.constant 0 : index
    %c0_0 = arith.constant 0 : index
    %0 = vector.load %arg1[%c0, %c0_0] : memref<8x256xf32, #tpu.memory_space<vmem>>, vector<8x256xf32>
    %c0_1 = arith.constant 0 : index
    %c0_2 = arith.constant 0 : index
    %1 = vector.load %arg2[%c0_1, %c0_2] : memref<256x56xf32, #tpu.memory_space<vmem>>, vector<256x56xf32>
    %cst = arith.constant dense<0.000000e+00> : vector<8x56xf32>
    %2 = tpu.matmul %0, %1, %cst {dimension_numbers = #tpu.dot_dimension_numbers<[1], [0], [0], [1], [0, 0, 1, 1], [], []>} : vector<8x256xf32>, vector<256x56xf32>, vector<8x56xf32> -> vector<8x56xf32>
    %c0_3 = arith.constant 0 : index
    %c0_4 = arith.constant 0 : index
    %3 = vector.load %arg3[%c0_3, %c0_4] : memref<1x56xf32, #tpu.memory_space<vmem>>, vector<1x56xf32>
    %4 = vector.broadcast %3 : vector<1x56xf32> to vector<8x56xf32>
    %5 = arith.addf %2, %4 : vector<8x56xf32>
    %cst_5 = arith.constant 0.000000e+00 : f32
    %6 = vector.broadcast %cst_5 : f32 to vector<8x56xf32>
    %7 = arith.maximumf %5, %6 : vector<8x56xf32>
    %c0_6 = arith.constant 0 : index
    %c0_7 = arith.constant 0 : index
    %8 = vector.load %arg4[%c0_6, %c0_7] : memref<56x96xf32, #tpu.memory_space<vmem>>, vector<56x96xf32>
    %cst_8 = arith.constant dense<0.000000e+00> : vector<8x96xf32>
    %9 = tpu.matmul %7, %8, %cst_8 {dimension_numbers = #tpu.dot_dimension_numbers<[1], [0], [0], [1], [0, 0, 1, 1], [], []>} : vector<8x56xf32>, vector<56x96xf32>, vector<8x96xf32> -> vector<8x96xf32>
    %c0_9 = arith.constant 0 : index
    %c0_10 = arith.constant 0 : index
    %10 = vector.load %arg5[%c0_9, %c0_10] : memref<1x96xf32, #tpu.memory_space<vmem>>, vector<1x96xf32>
    %11 = vector.broadcast %10 : vector<1x96xf32> to vector<8x96xf32>
    %12 = arith.addf %9, %11 : vector<8x96xf32>
    %cst_11 = arith.constant 0.000000e+00 : f32
    %13 = vector.broadcast %cst_11 : f32 to vector<8x96xf32>
    %14 = arith.maximumf %12, %13 : vector<8x96xf32>
    %15 = vector.extract_strided_slice %14 {offsets = [0, 0], sizes = [8, 8], strides = [1, 1]} : vector<8x96xf32> to vector<8x8xf32>
    %16 = vector.extract_strided_slice %14 {offsets = [0, 8], sizes = [8, 8], strides = [1, 1]} : vector<8x96xf32> to vector<8x8xf32>
    %17 = arith.maximumf %15, %16 : vector<8x8xf32>
    %18 = vector.extract_strided_slice %14 {offsets = [0, 16], sizes = [8, 8], strides = [1, 1]} : vector<8x96xf32> to vector<8x8xf32>
    %19 = arith.maximumf %17, %18 : vector<8x8xf32>
    %20 = vector.extract_strided_slice %14 {offsets = [0, 24], sizes = [8, 8], strides = [1, 1]} : vector<8x96xf32> to vector<8x8xf32>
    %21 = arith.maximumf %19, %20 : vector<8x8xf32>
    %22 = vector.extract_strided_slice %14 {offsets = [0, 32], sizes = [8, 8], strides = [1, 1]} : vector<8x96xf32> to vector<8x8xf32>
    %23 = arith.maximumf %21, %22 : vector<8x8xf32>
    %24 = vector.extract_strided_slice %14 {offsets = [0, 40], sizes = [8, 8], strides = [1, 1]} : vector<8x96xf32> to vector<8x8xf32>
    %25 = arith.maximumf %23, %24 : vector<8x8xf32>
    %26 = vector.extract_strided_slice %14 {offsets = [0, 48], sizes = [8, 8], strides = [1, 1]} : vector<8x96xf32> to vector<8x8xf32>
    %27 = arith.maximumf %25, %26 : vector<8x8xf32>
    %28 = vector.extract_strided_slice %14 {offsets = [0, 56], sizes = [8, 8], strides = [1, 1]} : vector<8x96xf32> to vector<8x8xf32>
    %29 = arith.maximumf %27, %28 : vector<8x8xf32>
    %30 = vector.extract_strided_slice %14 {offsets = [0, 64], sizes = [8, 8], strides = [1, 1]} : vector<8x96xf32> to vector<8x8xf32>
    %31 = arith.maximumf %29, %30 : vector<8x8xf32>
    %32 = vector.extract_strided_slice %14 {offsets = [0, 72], sizes = [8, 8], strides = [1, 1]} : vector<8x96xf32> to vector<8x8xf32>
    %33 = arith.maximumf %31, %32 : vector<8x8xf32>
    %34 = vector.extract_strided_slice %14 {offsets = [0, 80], sizes = [8, 8], strides = [1, 1]} : vector<8x96xf32> to vector<8x8xf32>
    %35 = arith.maximumf %33, %34 : vector<8x8xf32>
    %36 = vector.extract_strided_slice %14 {offsets = [0, 88], sizes = [8, 8], strides = [1, 1]} : vector<8x96xf32> to vector<8x8xf32>
    %37 = arith.maximumf %35, %36 : vector<8x8xf32>
    %c0_12 = arith.constant 0 : index
    %c0_13 = arith.constant 0 : index
    %38 = vector.load %arg6[%c0_12, %c0_13] : memref<8x16xf32, #tpu.memory_space<vmem>>, vector<8x16xf32>
    %cst_14 = arith.constant dense<0.000000e+00> : vector<8x16xf32>
    %39 = tpu.matmul %37, %38, %cst_14 {dimension_numbers = #tpu.dot_dimension_numbers<[1], [0], [0], [1], [0, 0, 1, 1], [], []>} : vector<8x8xf32>, vector<8x16xf32>, vector<8x16xf32> -> vector<8x16xf32>
    %c0_15 = arith.constant 0 : index
    %c0_16 = arith.constant 0 : index
    %40 = vector.load %arg7[%c0_15, %c0_16] : memref<1x16xf32, #tpu.memory_space<vmem>>, vector<1x16xf32>
    %41 = vector.broadcast %40 : vector<1x16xf32> to vector<8x16xf32>
    %42 = arith.addf %39, %41 : vector<8x16xf32>
    %c0_17 = arith.constant 0 : index
    %c0_18 = arith.constant 0 : index
    %43 = vector.load %arg8[%c0_17, %c0_18] : memref<8x16xf32, #tpu.memory_space<vmem>>, vector<8x16xf32>
    tpu.vector_store %arg8[%c0_17, %c0_18], %42 {strides = array<i32>} : memref<8x16xf32, #tpu.memory_space<vmem>>, vector<8x16xf32>,
    return
  }
  func.func @transform_0(%arg0: i32) -> (i32, i32) {
    %c0_i32 = arith.constant 0 : i32
    %c0_i32_0 = arith.constant 0 : i32
    return %arg0, %c0_i32 : i32, i32
  }
  func.func @transform_1(%arg0: i32) -> (i32, i32) {
    %c0_i32 = arith.constant 0 : i32
    %c0_i32_0 = arith.constant 0 : i32
    %c0_i32_1 = arith.constant 0 : i32
    return %c0_i32, %c0_i32_0 : i32, i32
  }
  func.func @transform_2(%arg0: i32) -> (i32, i32) {
    %c0_i32 = arith.constant 0 : i32
    %c0_i32_0 = arith.constant 0 : i32
    %c0_i32_1 = arith.constant 0 : i32
    return %c0_i32, %c0_i32_0 : i32, i32
  }
  func.func @transform_3(%arg0: i32) -> (i32, i32) {
    %c0_i32 = arith.constant 0 : i32
    %c0_i32_0 = arith.constant 0 : i32
    %c0_i32_1 = arith.constant 0 : i32
    return %c0_i32, %c0_i32_0 : i32, i32
  }
  func.func @transform_4(%arg0: i32) -> (i32, i32) {
    %c0_i32 = arith.constant 0 : i32
    %c0_i32_0 = arith.constant 0 : i32
    %c0_i32_1 = arith.constant 0 : i32
    return %c0_i32, %c0_i32_0 : i32, i32
  }
  func.func @transform_5(%arg0: i32) -> (i32, i32) {
    %c0_i32 = arith.constant 0 : i32
    %c0_i32_0 = arith.constant 0 : i32
    %c0_i32_1 = arith.constant 0 : i32
    return %c0_i32, %c0_i32_0 : i32, i32
  }
  func.func @transform_6(%arg0: i32) -> (i32, i32) {
    %c0_i32 = arith.constant 0 : i32
    %c0_i32_0 = arith.constant 0 : i32
    %c0_i32_1 = arith.constant 0 : i32
    return %c0_i32, %c0_i32_0 : i32, i32
  }
  func.func @transform_7(%arg0: i32) -> (i32, i32) {
    %c0_i32 = arith.constant 0 : i32
    %c0_i32_0 = arith.constant 0 : i32
    return %arg0, %c0_i32 : i32, i32
  }
}

</mosaic_0001>

<bundles_post_ra>
// kernel: tpu_custom_call.1
= control target key start
LH: loop header
LB: loop body
LE: loop exit
PB: predicated region body
PF: predicated region fallthrough
CT: control target
= control target key end

     0   :  { %v523_v7 = vmov 0.0|0.0   ;;  %s725_s0 = inlined_call_operand.vmem [shape: f32[8,256], index: 0, kind: input, shape index: {}]   ;;  %s726_s1 = inlined_call_operand.vmem [shape: f32[256,56], index: 1, kind: input, shape index: {}]   ;;  %s727_s2 = inlined_call_operand.vmem [shape: f32[1,56], index: 2, kind: input, shape index: {}]   ;;  %s728_s3 = inlined_call_operand.vmem [shape: f32[56,96], index: 3, kind: input, shape index: {}]   ;;  %s729_s4 = inlined_call_operand.vmem [shape: f32[1,96], index: 4, kind: input, shape index: {}]   ;;  %s730_s5 = inlined_call_operand.vmem [shape: f32[8,16], index: 5, kind: input, shape index: {}]   ;;  %s731_s6 = inlined_call_operand.vmem [shape: f32[1,16], index: 6, kind: input, shape index: {}]   ;;  %s732_s7 = inlined_call_operand.hbm [shape: f32[8,16], index: 7, kind: output, shape index: {}]  }
   0x1   :  { %v45_v0 = vld [vmem:[%s726_s1 + $0x80] sm:$0xff]  ;;  %v46_v1 = vld [vmem:[%s726_s1 + $0x88] sm:$0xff]  ;;  %v47_v5 = vld [vmem:[%s726_s1 + $0x90] sm:$0xff]  ;;  %475 = vmatprep.subr.bf16.mxu1 %v523_v7 }
   0x2   :  { %v29_v2 = vld [vmem:[%s726_s1] sm:$0xff]  ;;  %v443_v3 = vpack.c.bf16 %v46_v1, %v45_v0  ;;  %v30_v4 = vld [vmem:[%s726_s1 + $0x8] sm:$0xff]  ;;  %v48_v6 = vld [vmem:[%s726_s1 + $0x98] sm:$0xff] }
   0x3   :  { %v445_v8 = vpack.c.bf16 %v30_v4, %v29_v2  ;;  %v447_v9 = vpack.c.bf16 %v48_v6, %v47_v5  ;;  %v31_v10 = vld [vmem:[%s726_s1 + $0x10] sm:$0xff]  ;;  %v32_v11 = vld [vmem:[%s726_s1 + $0x18] sm:$0xff]  ;;  %v49_v12 = vld [vmem:[%s726_s1 + $0xa0] sm:$0xff] }
   0x4   :  { %444 = vmatprep.subr.bf16.mxu0 %v443_v3  ;;  %v50_v13 = vld [vmem:[%s726_s1 + $0xa8] sm:$0xff]  ;;  %v449_v14 = vpack.c.bf16 %v32_v11, %v31_v10  ;;  %v33_v16 = vld [vmem:[%s726_s1 + $0x20] sm:$0xff]  ;;  %v51_v18 = vld [vmem:[%s726_s1 + $0xb0] sm:$0xff] }
   0x5   :  { %446 = vmatpush3.bf16.msra.mxu0 %v445_v8  ;;  %v451_v15 = vpack.c.bf16 %v50_v13, %v49_v12  ;;  %v34_v17 = vld [vmem:[%s726_s1 + $0x28] sm:$0xff]  ;;  %v52_v19 = vld [vmem:[%s726_s1 + $0xb8] sm:$0xff]  ;;  %v35_v22 = vld [vmem:[%s726_s1 + $0x30] sm:$0xff] }
   0x6   :  { %448 = vmatprep.subr.bf16.mxu0 %v447_v9  ;;  %v453_v20 = vpack.c.bf16 %v34_v17, %v33_v16  ;;  %v455_v21 = vpack.c.bf16 %v52_v19, %v51_v18  ;;  %v36_v23 = vld [vmem:[%s726_s1 + $0x38] sm:$0xff]  ;;  %v53_v24 = vld [vmem:[%s726_s1 + $0xc0] sm:$0xff]  ;;  %v54_v25 = vld [vmem:[%s726_s1 + $0xc8] sm:$0xff] }
   0x7   :  { %v28_v26 = vld [vmem:[%s725_s0 + $0x8] sm:$0xff]  ;;  %v139_v27 = vld [vmem:[%s728_s3] sm:$0xff]  ;;  %v457_v29 = vpack.c.bf16 %v36_v23, %v35_v22  ;;  %v141_v31 = vld [vmem:[%s728_s3 + $0x10] sm:$0xff] }
   0x8   :  { %132 = vmatprep.mubr.f32.mxu0 %v28_v26  ;;  %v140_v28 = vld [vmem:[%s728_s3 + $0x8] sm:$0xff]  ;;  %v142_v32 = vld [vmem:[%s728_s3 + $0x18] sm:$0xff] }
   0x9   :  { %450 = vmatpush3.bf16.msra.mxu0 %v449_v14  ;;  %v476_v30 = vpack.c.bf16 %v140_v28, %v139_v27 }
   0xa   :  { %452 = vmatprep.subr.bf16.mxu0 %v451_v15 }
   0xd   :  { %454 = vmatpush3.bf16.msra.mxu0 %v453_v20 }
   0xe   :  { %12 = vsyncpa [#allocation3], 0  ;;  %456 = vmatprep.subr.bf16.mxu0 %v455_v21  ;;  %v459_v33 = vpack.c.bf16 %v54_v25, %v53_v24  ;;  %v37_v34 = vld [vmem:[%s726_s1 + $0x40] sm:$0xff]  ;;  %v38_v35 = vld [vmem:[%s726_s1 + $0x48] sm:$0xff]  ;;  %477 = vmatpush3.bf16.msra.mxu1 %v476_v30  ;;  %v479_v38 = vpack.c.bf16 %v142_v32, %v141_v31  ;;  %v524_v60 = vmov 0.0   ;;  %vm525_vm0 = vmmov 0  }
   0xf   :  { %v55_v36 = vld [vmem:[%s726_s1 + $0xd0] sm:$0xff]  ;;  %v56_v37 = vld [vmem:[%s726_s1 + $0xd8] sm:$0xff]  ;;  %478 = vmatprep.subr.bf16.mxu1 %v523_v7  ;;  %v461_v39 = vpack.c.bf16 %v38_v35, %v37_v34  ;;  %v57_v43 = vld [vmem:[%s726_s1 + $0xe0] sm:$0xff]  ;;  %435 = vmatprep.mubr.msk.f32.mxu1 %vm525_vm0, %v524_v60  ;;  %vm153_vm1 = vcmask 457728   ;;  %s527_s16 = smov 120   ;;  %s529_s17 = smov 112  }
  0x10   :  { %v463_v40 = vpack.c.bf16 %v56_v37, %v55_v36  ;;  %v39_v41 = vld [vmem:[%s726_s1 + $0x50] sm:$0xff]  ;;  %v40_v42 = vld [vmem:[%s726_s1 + $0x58] sm:$0xff]  ;;  %v58_v44 = vld [vmem:[%s726_s1 + $0xe8] sm:$0xff]  ;;  %s530_s18 = smov 80   ;;  %s531_s19 = smov 88   ;;  %vm281_vm2 = vcmask 64512  }
  0x11   :  { %458 = vmatpush3.bf16.msra.mxu0 %v457_v29  ;;  %v465_v45 = vpack.c.bf16 %v40_v42, %v39_v41  ;;  %v467_v46 = vpack.c.bf16 %v58_v44, %v57_v43  ;;  %v41_v47 = vld [vmem:[%s726_s1 + $0x60] sm:$0xff]  ;;  %v42_v48 = vld [vmem:[%s726_s1 + $0x68] sm:$0xff]  ;;  %v59_v49 = vld [vmem:[%s726_s1 + $0xf0] sm:$0xff]  ;;  %s533_s22 = smov 72   ;;  %s534_s23 = smov 48   ;;  %vm355_vm3 = vcmask 130048  }
  0x12   :  { %460 = vmatprep.subr.bf16.mxu0 %v459_v33  ;;  %480 = vmatpush3.bf16.msra.mxu1 %v479_v38  ;;  %v60_v50 = vld [vmem:[%s726_s1 + $0xf8] sm:$0xff]  ;;  %v469_v51 = vpack.c.bf16 %v42_v48, %v41_v47  ;;  %v43_v53 = vld [vmem:[%s726_s1 + $0x70] sm:$0xff]  ;;  %v27_v56 = vld [vmem:[%s725_s0] sm:$0xff]  ;;  %s535_s24 = smov 56   ;;  %s536_s25 = smov 40  }
  0x13   :  { %481 = vmatprep.subr.bf16.mxu1 %v523_v7  ;;  %v471_v52 = vpack.c.bf16 %v60_v50, %v59_v49  ;;  %v44_v54 = vld [vmem:[%s726_s1 + $0x78] sm:$0xff]  ;;  %v143_v57 = vld [vmem:[%s728_s3 + $0x20] sm:$0xff]  ;;  %v144_v58 = vld [vmem:[%s728_s3 + $0x28] sm:$0xff]  ;;  %s537_s27 = smov [#allocation2]  }
  0x14   :  { %v473_v55 = vpack.c.bf16 %v44_v54, %v43_v53  ;;  %v482_v59 = vpack.c.bf16 %v144_v58, %v143_v57  ;;  %v145_v61 = vld [vmem:[%s728_s3 + $0x30] sm:$0xff]  ;;  %v371_v63 = vld [vmem:[%s727_s2] ss:$0 sm:$0xff]  ;;  %s526_s3 = smov 104   ;;  %s528_s2 = smov 96  }
  0x15   :  { %462 = vmatpush3.bf16.msra.mxu0 %v461_v39  ;;  %v372_v4 = vld [vmem:[%s729_s4] ss:$0 sm:$0xff]  ;;  %s532_s4 = smov 64   ;;  %s363_s28 = sshll.u32 %s537_s27, 4  ;;  %s364_s28 = int_to_ptr.vmem [resolvable:$true] %s363_s28 }
  0x16   :  { %464 = vmatprep.subr.bf16.mxu0 %v463_v40  ;;  %483 = vmatpush3.bf16.msra.mxu1 %v482_v59  ;;  %v273_v9 = vld [vmem:[%s730_s5] sm:$0xff]  ;;  %s499_s29 = scalar_lea.vmem %s364_s28, 128  ;;  %p504_p1 = scmp.lt.s32.totalorder %s364_s28, %s364_s28 }
  0x17   :  { %433 = vmatprep.subr.mxu1 %v524_v60  ;;  %v374_v32 = vld [vmem:[%s731_s6] ss:$0 sm:$0xff]  ;;  %p500_p0 = scmp.ne.s32.totalorder %s364_s28, %s499_s29  ;;  %p505_p2 = scmp.lt.s32.totalorder %s499_s29, %s499_s29 }
  0x19   :  { %466 = vmatpush3.bf16.msra.mxu0 %v465_v45  ;;  %p506_p3 = por %p505_p2, %p504_p1 }
  0x1a   :  { %468 = vmatprep.subr.bf16.mxu0 %v467_v46  ;;  %434 = vmatpush3.msra.mxu1 %v145_v61 }
  0x1b   :  { %438 = vmatprep.subr.mxu1 %v524_v60  ;;  %p507_p4 = pnand %p506_p3, %p500_p0 }
  0x1d   :  { %470 = vmatpush3.bf16.msra.mxu0 %v469_v51 }
  0x1e   :  { %472 = vmatprep.subr.bf16.mxu0 %v471_v52 }
  0x21   :  { %474 = vmatpush3.bf16.msra.mxu0 %v473_v55 }
  0x24   :  { %133 = vmatmul.mubr.f32.vlgmr.msra.gmra.mrb[0].mxu0 %v27_v56 }
  0xf7   :  { %v408_v62 = vpop.f32.mrb[0].mxu0 }
  0xf8   :  { %v409_v0 = vpop.f32.mrb[1].mxu0 }
  0xf9   :  { %v410_v1 = vadd.f32 %v409_v0, %v408_v62 }
  0xfb   :  { %v135_v2 = vadd.f32 %v410_v1, %v371_v63 }
  0xfd   :  { %v138_v3 = vmax.f32 %v135_v2, 0.0 }
  0xff   :  { %436 = vmatmul.mubr.msk.f32.vlgmr.msra.gmra.mrb[0].mxu1 %vm153_vm1, %v138_v3 }
 0x100   :  { %440 = vmatprep.mubr.msk.f32.mxu1 %vm525_vm0, %v524_v60  ;;  %439 = vmatpush3.msra.mxu1 %v273_v9 }
 0x1d2   :  { %v223_v5 = vpop.f32.mrb[0].mxu1 }
 0x1d3   :  { %v224_v6 = vadd.f32 %v372_v4, %v223_v5  ;;  %v437_v7 = vpop.f32.mrb[1].mxu1 }
 0x1d5   :  { %v227_v8 = vmax.f32 %v224_v6, 0.0 }
 0x1d7   :  { %237 = vrot.lane.b32.xlu1 %v227_v8, %s526_s3  ;;  %229 = vrot.lane.b32.xlu0 %v227_v8, %s527_s16 }
 0x1db   :  { %241 = vrot.lane.b32.xlu1 %v227_v8, %s528_s2  ;;  %233 = vrot.lane.b32.xlu0 %v227_v8, %s529_s17 }
 0x1df   :  { %249 = vrot.lane.b32.xlu1 %v227_v8, %s530_s18  ;;  %245 = vrot.lane.b32.xlu0 %v227_v8, %s531_s19 }
 0x1e3   :  { %257 = vrot.lane.b32.xlu1 %v227_v8, %s532_s4  ;;  %253 = vrot.lane.b32.xlu0 %v227_v8, %s533_s22 }
 0x1e7   :  { %265 = vrot.lane.b32.xlu1 %v227_v8, %s534_s23  ;;  %261 = vrot.lane.b32.xlu0 %v227_v8, %s535_s24 }
 0x1eb   :  { %269 = vrot.lane.b32.xlu0 %v227_v8, %s536_s25 }
 0x249   :  { %v238_v10 = vpop.permute.xlu1 %237  ;;  %v230_v11 = vpop.permute.xlu0 %229 }
 0x24a   :  { %v232_v12 = vmax.f32 %v227_v8, %v230_v11 }
 0x24d   :  { %v242_v13 = vpop.permute.xlu1 %241  ;;  %v234_v14 = vpop.permute.xlu0 %233 }
 0x24e   :  { %v236_v15 = vmax.f32 %v232_v12, %v234_v14 }
 0x250   :  { %v240_v16 = vmax.f32 %v236_v15, %v238_v10 }
 0x251   :  { %v250_v17 = vpop.permute.xlu1 %249  ;;  %v246_v18 = vpop.permute.xlu0 %245 }
 0x252   :  { %v244_v19 = vmax.f32 %v240_v16, %v242_v13 }
 0x254   :  { %v248_v20 = vmax.f32 %v244_v19, %v246_v18 }
 0x255   :  { %v254_v21 = vpop.permute.xlu0 %253  ;;  %v258_v23 = vpop.permute.xlu1 %257 }
 0x256   :  { %v252_v22 = vmax.f32 %v248_v20, %v250_v17 }
 0x258   :  { %v256_v24 = vmax.f32 %v252_v22, %v254_v21 }
 0x259   :  { %v262_v25 = vpop.permute.xlu0 %261  ;;  %v266_v28 = vpop.permute.xlu1 %265 }
 0x25a   :  { %v260_v26 = vmax.f32 %v256_v24, %v258_v23 }
 0x25c   :  { %v264_v27 = vmax.f32 %v260_v26, %v262_v25 }
 0x25d   :  { %v270_v30 = vpop.permute.xlu0 %269 }
 0x25e   :  { %v268_v29 = vmax.f32 %v264_v27, %v266_v28 }
 0x260   :  { %v272_v31 = vmax.f32 %v268_v29, %v270_v30 }
 0x262   :  { %441 = vmatmul.mubr.msk.f32.vlgmr.msra.gmra.mrb[2].mxu1 %vm281_vm2, %v272_v31 }
 0x335   :  { %v351_v33 = vpop.f32.mrb[2].mxu1 }
 0x336   :  { %v352_v34 = vadd.f32 %v374_v32, %v351_v33  ;;  %v442_v35 = vpop.f32.mrb[3].mxu1 }
 0x338   :  { %356 = vst.msk [vmem:[#allocation2] sm:$0xff] %vm355_vm3, %v352_v34 }
 0x339   :  { %510 = shalt.err (!%p507_p4)
}
 0x33a   :  { %s511_s9 = scalar_lea.hbm %s732_s7, 128 }
 0x33b   :  { %p512_p5 = scmp.ne.s32.totalorder %s732_s7, %s511_s9  ;;  %p515_p6 = scmp.lt.u32.totalorder %s511_s9, %s732_s7 }
 0x33d   :  { %p517_p7 = pnand %p515_p6, %p512_p5 }
 0x33f   :  { %520 = shalt.err (!%p517_p7)
}
 0x340   :  { %366 = dma.vmem_to_hbm [thread:$0]  %s364_s28, 128, %s732_s7, [#allocation3]  }
 0x341   :  { %521 = dma.done.wait [#allocation3], 128  }
 0x342   :  { %522 = vsyncadd [#allocation3], 4294967168 }
 0x343   :  { %370 = vsyncpa [#allocation3], 1 }

</bundles_post_ra>
